<compile_context>
chip_gen: v7x
topology: tpu7x:2x2x1
jax: 0.10.0
libtpu: 0.0.40
codegen_flags: <defaults>
</compile_context>

<pallas_src>
import math

import jax
import jax.numpy as jnp
from jax.experimental import pallas as pl
from jax.experimental.pallas import tpu as pltpu

KMAX = 5            # combined kernel size (largest scale)
PAD = KMAX // 2     # combined "same" padding
HALO = 8            # sublane-aligned halo fetch (>= PAD, multiple of 8)
LANE = 128


def _round_up(v, m):
    return -(-v // m) * m


def _vmem_capacity_bytes():
    """Physical VMEM per TensorCore; conservative fallback if the query is unavailable."""
    try:
        info = pltpu.get_tpu_info()
        for name in ("vmem_capacity_bytes", "vmem_bytes", "vmem_size_bytes"):
            v = getattr(info, name, None)
            if v:
                return int(v)
    except Exception:
        pass
    return 64 << 20     # v7x per-TC budget — the tightest of v5e / v6e / v7x


def _vmem_bytes(tl, c_in, c_out_p, in_sz, out_sz, w_sz, w_bufs):
    """Estimated VMEM footprint of one pipelined step at tile length `tl`."""
    b = 2 * tl * c_in * in_sz                       # x tile, double buffered
    b += 2 * 2 * HALO * c_in * in_sz                # two halo blocks, double buffered
    b += 2 * tl * c_out_p * out_sz                  # output tile, double buffered
    b += w_bufs * KMAX * c_in * c_out_p * w_sz      # folded weights (constant block index)
    b += w_bufs * c_out_p * 4                       # folded bias (f32)
    # in-body temporaries: xp concat, f32 accumulator, slack for shifted-slice copies
    b += (tl + 2 * PAD) * c_in * in_sz + tl * c_out_p * 4 + 2 * tl * c_in * in_sz
    return b


def _choose_tl(L, c_in, c_out_p, in_sz, out_sz, w_sz, w_bufs, budget):
    """Largest sublane-aligned tile that fits the VMEM budget; prefer one dividing
    round_up(L, 8) so no wrapper-side jnp.pad (full HBM pass over x) is needed."""
    l8 = _round_up(max(L, 1), HALO)
    fits = lambda t: _vmem_bytes(t, c_in, c_out_p, in_sz, out_sz, w_sz, w_bufs) <= budget
    if l8 <= 512 and fits(l8):
        return l8
    cands = [c for c in (512, 448, 384, 320, 256, 192, 128, 96, 64, 32, 16, 8) if c <= l8]
    fitting = [c for c in cands if fits(c)]
    if not fitting:
        return HALO
    no_pad = [c for c in fitting if l8 % c == 0]
    return no_pad[0] if no_pad else fitting[0]


def _multiscale_kernel(x_ref, left_ref, right_ref, w_ref, b_ref, o_ref):
    # x_ref    : (TL, C_in)              current L-tile (batch dim squeezed out)
    # left_ref : (HALO, C_in)            8 rows ending just before this tile (clamped)
    # right_ref: (HALO, C_in)            8 rows starting just after this tile (clamped)
    # w_ref    : (KMAX, C_in, C_out_p)   folded conv weights
    # b_ref    : (1, C_out_p)            folded bias (f32)
    # o_ref    : (TL, C_out_p)
    t = pl.program_id(1)
    nt = pl.num_programs(1)
    tl = x_ref.shape[0]

    cur = x_ref[...]
    # Zero the halos on the first / last tile (== Conv1d zero padding).
    left_gate = (t > 0).astype(cur.dtype)
    right_gate = (t < nt - 1).astype(cur.dtype)
    left = left_ref[HALO - PAD:, :] * left_gate      # (PAD, C_in)
    right = right_ref[:PAD, :] * right_gate          # (PAD, C_in)

    xp = jnp.concatenate([left, cur, right], axis=0)  # (TL + 2*PAD, C_in)

    # 5 accumulating MXU dots (same total K-work as the old fused im2col matmul, but without
    # the 5x-tile lane-axis concat copy).  Accumulation stays f32.
    acc = jnp.zeros((tl, o_ref.shape[1]), jnp.float32)
    for k in range(KMAX):
        acc = acc + jnp.dot(xp[k:k + tl, :], w_ref[k],
                            preferred_element_type=jnp.float32)
    o_ref[...] = (acc + b_ref[...]).astype(o_ref.dtype)


def multiscale_feature_extractor(x, w_combined, b_combined, *, tl=None, compute_dtype=None):
    """x: (B, L, C_in). w_combined: (KMAX, C_in, C_out). b_combined: (C_out,).

    compute_dtype=jnp.bfloat16 runs the MXU on bf16 operands and writes bf16 output
    (accumulation stays f32); this is intended input/output rounding vs. an f32 reference."""
    B, L, C_in = x.shape
    C_out = w_combined.shape[-1]

    if compute_dtype is not None:
        x = x.astype(compute_dtype)
        w_combined = w_combined.astype(compute_dtype)
    out_dtype = x.dtype                 # write-back in compute/original dtype (no f32 blowup)

    in_sz = jnp.dtype(x.dtype).itemsize
    w_sz = jnp.dtype(w_combined.dtype).itemsize
    out_sz = jnp.dtype(out_dtype).itemsize

    # Lane-dense output channels (avoid masked partial stores).
    C_out_p = _round_up(C_out, LANE)

    # Single-buffer the constant-index weight/bias blocks when pipeline_mode is available.
    weight_mode = None
    if hasattr(pl, "Buffered"):
        try:
            weight_mode = pl.Buffered(1)
        except Exception:
            weight_mode = None
    w_bufs = 1 if weight_mode is not None else 2

    vmem_cap = _vmem_capacity_bytes()
    budget = max(vmem_cap - (20 << 20), 24 << 20)   # leave headroom for compiler scratch

    if tl is None:
        tl = _choose_tl(L, C_in, C_out_p, in_sz, out_sz, w_sz, w_bufs, budget)
    assert tl % HALO == 0, "tile length must be a multiple of 8 (sublanes)"

    L_pad = _round_up(L, tl)
    if L_pad != L:      # only hit when no divisor tile fits (or an explicit tl was requested)
        x = jnp.pad(x, ((0, 0), (0, L_pad - L), (0, 0)))
    nt = L_pad // tl

    w3d = w_combined
    bias = b_combined
    if C_out_p != C_out:
        w3d = jnp.pad(w3d, ((0, 0), (0, 0), (0, C_out_p - C_out)))
        bias = jnp.pad(bias, (0, C_out_p - C_out))
    bias2d = bias.reshape(1, C_out_p).astype(jnp.float32)

    blocks_per_tile = tl // HALO
    last_halo_blk = L_pad // HALO - 1

    x_map = lambda b, t: (b, t, 0)
    left_map = lambda b, t: (b, jnp.maximum(t * blocks_per_tile - 1, 0), 0)
    right_map = lambda b, t: (b, jnp.minimum((t + 1) * blocks_per_tile, last_halo_blk), 0)

    need = _vmem_bytes(tl, C_in, C_out_p, in_sz, out_sz, w_sz, w_bufs)
    vmem_limit = int(min(max(int(need * 1.25) + (4 << 20), 32 << 20),
                         max(vmem_cap - (8 << 20), 32 << 20)))

    cost = pl.CostEstimate(
        flops=2 * B * L_pad * KMAX * C_in * C_out_p,
        transcendentals=0,
        bytes_accessed=int(B * L_pad * C_in * in_sz
                           + B * L_pad * C_out_p * out_sz
                           + KMAX * C_in * C_out_p * w_sz + C_out_p * 4),
    )

    def build(w_mode):
        extra = {} if w_mode is None else {"pipeline_mode": w_mode}
        return pl.pallas_call(
            _multiscale_kernel,
            out_shape=jax.ShapeDtypeStruct((B, L_pad, C_out_p), out_dtype),
            grid_spec=pltpu.PrefetchScalarGridSpec(
                num_scalar_prefetch=0,
                # Both axes parallel; B*nt >= 2 keeps both v7x TensorCores busy (no-op on 1-TC chips).
                grid=(B, nt),
                in_specs=[
                    pl.BlockSpec((pl.Squeezed(), tl, C_in), x_map),
                    pl.BlockSpec((pl.Squeezed(), HALO, C_in), left_map),
                    pl.BlockSpec((pl.Squeezed(), HALO, C_in), right_map),
                    pl.BlockSpec((KMAX, C_in, C_out_p), lambda b, t: (0, 0, 0), **extra),
                    pl.BlockSpec((1, C_out_p), lambda b, t: (0, 0), **extra),
                ],
                out_specs=pl.BlockSpec((pl.Squeezed(), tl, C_out_p), x_map),
            ),
            compiler_params=pltpu.CompilerParams(
                dimension_semantics=("parallel", "parallel"),
                vmem_limit_bytes=vmem_limit,
            ),
            cost_estimate=cost,
        )

    try:
        out = build(weight_mode)(x, x, x, w3d, bias2d)
    except Exception:
        # pipeline_mode unsupported on this JAX version -> default (double-buffered) specs.
        out = build(None)(x, x, x, w3d, bias2d)

    if L_pad != L or C_out_p != C_out:
        out = out[:, :L, :C_out]
    return out


def init_conv1d_params(key, in_ch, out_ch, ksize):
    """Deterministic init mimicking PyTorch Conv1d default bounds."""
    kw, kb = jax.random.split(key)
    fan_in = in_ch * ksize
    bound = 1.0 / math.sqrt(fan_in)
    w = jax.random.uniform(kw, (out_ch, in_ch, ksize), jnp.float32, -bound, bound)
    b = jax.random.uniform(kb, (out_ch,), jnp.float32, -bound, bound)
    return w, b


def build_combined_params(key, input_dim, model_dim, scales=(1, 3, 5)):
    """Fold the per-scale Conv1d weights into one equivalent kernel-size-5 conv."""
    keys = jax.random.split(key, len(scales))
    w_combined = jnp.zeros((KMAX, input_dim, model_dim), jnp.float32)
    b_combined = jnp.zeros((model_dim,), jnp.float32)
    per_scale = []
    for sk, scale in zip(keys, scales):
        w, b = init_conv1d_params(sk, input_dim, model_dim, scale)
        per_scale.append((w, b, scale))
        pad = scale // 2
        # tap k of this conv touches offset (k - pad); combined index = offset + PAD
        for k in range(scale):
            idx = k - pad + PAD
            w_combined = w_combined.at[idx].add(jnp.transpose(w[:, :, k], (1, 0)))
        b_combined = b_combined + b
    return w_combined, b_combined, per_scale


def reference_forward(x, per_scale):
    """Pure-JAX reference matching the PyTorch module exactly."""
    B, L, _ = x.shape
    out = None
    for w, b, scale in per_scale:
        pad = scale // 2
        xp = jnp.pad(x, ((0, 0), (pad, pad), (0, 0)))
        acc = jnp.zeros((B, L, w.shape[0]), jnp.float32)
        for k in range(scale):
            acc = acc + jnp.einsum('blc,oc->blo', xp[:, k:k + L, :], w[:, :, k])
        acc = acc + b
        out = acc if out is None else out + acc
    return out


if __name__ == "__main__":
    B, L, input_dim, model_dim = 2, 40, 4, 32
    key = jax.random.PRNGKey(0)
    kx, kp = jax.random.split(key)
    x = jax.random.normal(kx, (B, L, input_dim), jnp.float32)

    w_combined, b_combined, per_scale = build_combined_params(kp, input_dim, model_dim)
    ref = reference_forward(x, per_scale)

    # tl=16 exercises multi-tile halos and the L-padding path (L=40 -> 48) at small size.
    out_tiled = jax.block_until_ready(
        multiscale_feature_extractor(x, w_combined, b_combined, tl=16))
    assert out_tiled.shape == (B, L, model_dim)
    assert jnp.allclose(out_tiled, ref, atol=1e-4, rtol=1e-4), \
        float(jnp.max(jnp.abs(out_tiled - ref)))

    # Auto tiling: single 8-aligned tile, no wrapper-side L padding needed for L=40.
    out_auto = jax.block_until_ready(
        multiscale_feature_extractor(x, w_combined, b_combined))
    assert out_auto.shape == (B, L, model_dim)
    assert jnp.allclose(out_auto, ref, atol=1e-4, rtol=1e-4), \
        float(jnp.max(jnp.abs(out_auto - ref)))

    print("KERNEL_OK")
</pallas_src>

<mosaic_0001>
module attributes {stable_mosaic.version = 11 : i64} {
  func.func @_multiscale_kernel(%arg0: i32, %arg1: i32, %arg2: memref<1x16x4xf32, #tpu.memory_space<vmem>>, %arg3: memref<1x8x4xf32, #tpu.memory_space<vmem>>, %arg4: memref<1x8x4xf32, #tpu.memory_space<vmem>>, %arg5: memref<5x4x128xf32, #tpu.memory_space<vmem>>, %arg6: memref<1x128xf32, #tpu.memory_space<vmem>>, %arg7: memref<1x16x128xf32, #tpu.memory_space<vmem>>) attributes {dimension_semantics = [#tpu.dimension_semantics<parallel>, #tpu.dimension_semantics<parallel>], iteration_bounds = array<i64: 2, 3>, scalar_prefetch = 0 : i64, scratch_operands = 0 : i64, tpu.core_type = #tpu.core_type<tc>, window_params = [{transform_indices = @transform_0, window_bounds = array<i64: 1, 16, 4>}, {transform_indices = @transform_1, window_bounds = array<i64: 1, 8, 4>}, {transform_indices = @transform_2, window_bounds = array<i64: 1, 8, 4>}, {pipeline_mode = #tpu.pipeline_mode<synchronous>, transform_indices = @transform_3, window_bounds = array<i64: 5, 4, 128>}, {pipeline_mode = #tpu.pipeline_mode<synchronous>, transform_indices = @transform_4, window_bounds = array<i64: 1, 128>}, {transform_indices = @transform_5, window_bounds = array<i64: 1, 16, 128>}]} {
    %c0 = arith.constant 0 : index
    %c0_0 = arith.constant 0 : index
    %c0_1 = arith.constant 0 : index
    %0 = vector.load %arg2[%c0, %c0_0, %c0_1] : memref<1x16x4xf32, #tpu.memory_space<vmem>>, vector<1x16x4xf32>
    %1 = vector.shape_cast %0 : vector<1x16x4xf32> to vector<16x4xf32>
    %c0_i32 = arith.constant 0 : i32
    %2 = arith.cmpi sgt, %arg1, %c0_i32 : i32
    %3 = arith.extui %2 : i1 to i32
    %4 = arith.sitofp %3 : i32 to f32
    %c2_i32 = arith.constant 2 : i32
    %5 = arith.cmpi slt, %arg1, %c2_i32 : i32
    %6 = arith.extui %5 : i1 to i32
    %7 = arith.sitofp %6 : i32 to f32
    %c0_2 = arith.constant 0 : index
    %c6 = arith.constant 6 : index
    %c0_3 = arith.constant 0 : index
    %8 = vector.load %arg3[%c0_2, %c6, %c0_3] : memref<1x8x4xf32, #tpu.memory_space<vmem>>, vector<1x2x4xf32>
    %9 = vector.shape_cast %8 : vector<1x2x4xf32> to vector<2x4xf32>
    %10 = vector.broadcast %4 : f32 to vector<2x4xf32>
    %11 = arith.mulf %9, %10 : vector<2x4xf32>
    %c0_4 = arith.constant 0 : index
    %c0_5 = arith.constant 0 : index
    %c0_6 = arith.constant 0 : index
    %12 = vector.load %arg4[%c0_4, %c0_5, %c0_6] : memref<1x8x4xf32, #tpu.memory_space<vmem>>, vector<1x2x4xf32>
    %13 = vector.shape_cast %12 : vector<1x2x4xf32> to vector<2x4xf32>
    %14 = vector.broadcast %7 : f32 to vector<2x4xf32>
    %15 = arith.mulf %13, %14 : vector<2x4xf32>
    %16 = tpu.concatenate %11, %1, %15 in 0 : vector<2x4xf32>, vector<16x4xf32>, vector<2x4xf32> -> vector<20x4xf32>
    %cst = arith.constant 0.000000e+00 : f32
    %17 = vector.broadcast %cst : f32 to vector<16x128xf32>
    %18 = vector.extract_strided_slice %16 {offsets = [0, 0], sizes = [16, 4], strides = [1, 1]} : vector<20x4xf32> to vector<16x4xf32>
    %c0_7 = arith.constant 0 : index
    %c0_8 = arith.constant 0 : index
    %c0_9 = arith.constant 0 : index
    %19 = vector.load %arg5[%c0_7, %c0_8, %c0_9] : memref<5x4x128xf32, #tpu.memory_space<vmem>>, vector<1x4x128xf32>
    %20 = vector.shape_cast %19 : vector<1x4x128xf32> to vector<4x128xf32>
    %cst_10 = arith.constant dense<0.000000e+00> : vector<16x128xf32>
    %21 = tpu.matmul %18, %20, %cst_10 {dimension_numbers = #tpu.dot_dimension_numbers<[1], [0], [0], [1], [0, 0, 1, 1], [], []>} : vector<16x4xf32>, vector<4x128xf32>, vector<16x128xf32> -> vector<16x128xf32>
    %22 = arith.addf %17, %21 : vector<16x128xf32>
    %23 = vector.extract_strided_slice %16 {offsets = [1, 0], sizes = [16, 4], strides = [1, 1]} : vector<20x4xf32> to vector<16x4xf32>
    %c1 = arith.constant 1 : index
    %c0_11 = arith.constant 0 : index
    %c0_12 = arith.constant 0 : index
    %24 = vector.load %arg5[%c1, %c0_11, %c0_12] : memref<5x4x128xf32, #tpu.memory_space<vmem>>, vector<1x4x128xf32>
    %25 = vector.shape_cast %24 : vector<1x4x128xf32> to vector<4x128xf32>
    %cst_13 = arith.constant dense<0.000000e+00> : vector<16x128xf32>
    %26 = tpu.matmul %23, %25, %cst_13 {dimension_numbers = #tpu.dot_dimension_numbers<[1], [0], [0], [1], [0, 0, 1, 1], [], []>} : vector<16x4xf32>, vector<4x128xf32>, vector<16x128xf32> -> vector<16x128xf32>
    %27 = arith.addf %22, %26 : vector<16x128xf32>
    %28 = vector.extract_strided_slice %16 {offsets = [2, 0], sizes = [16, 4], strides = [1, 1]} : vector<20x4xf32> to vector<16x4xf32>
    %c2 = arith.constant 2 : index
    %c0_14 = arith.constant 0 : index
    %c0_15 = arith.constant 0 : index
    %29 = vector.load %arg5[%c2, %c0_14, %c0_15] : memref<5x4x128xf32, #tpu.memory_space<vmem>>, vector<1x4x128xf32>
    %30 = vector.shape_cast %29 : vector<1x4x128xf32> to vector<4x128xf32>
    %cst_16 = arith.constant dense<0.000000e+00> : vector<16x128xf32>
    %31 = tpu.matmul %28, %30, %cst_16 {dimension_numbers = #tpu.dot_dimension_numbers<[1], [0], [0], [1], [0, 0, 1, 1], [], []>} : vector<16x4xf32>, vector<4x128xf32>, vector<16x128xf32> -> vector<16x128xf32>
    %32 = arith.addf %27, %31 : vector<16x128xf32>
    %33 = vector.extract_strided_slice %16 {offsets = [3, 0], sizes = [16, 4], strides = [1, 1]} : vector<20x4xf32> to vector<16x4xf32>
    %c3 = arith.constant 3 : index
    %c0_17 = arith.constant 0 : index
    %c0_18 = arith.constant 0 : index
    %34 = vector.load %arg5[%c3, %c0_17, %c0_18] : memref<5x4x128xf32, #tpu.memory_space<vmem>>, vector<1x4x128xf32>
    %35 = vector.shape_cast %34 : vector<1x4x128xf32> to vector<4x128xf32>
    %cst_19 = arith.constant dense<0.000000e+00> : vector<16x128xf32>
    %36 = tpu.matmul %33, %35, %cst_19 {dimension_numbers = #tpu.dot_dimension_numbers<[1], [0], [0], [1], [0, 0, 1, 1], [], []>} : vector<16x4xf32>, vector<4x128xf32>, vector<16x128xf32> -> vector<16x128xf32>
    %37 = arith.addf %32, %36 : vector<16x128xf32>
    %38 = vector.extract_strided_slice %16 {offsets = [4, 0], sizes = [16, 4], strides = [1, 1]} : vector<20x4xf32> to vector<16x4xf32>
    %c4 = arith.constant 4 : index
    %c0_20 = arith.constant 0 : index
    %c0_21 = arith.constant 0 : index
    %39 = vector.load %arg5[%c4, %c0_20, %c0_21] : memref<5x4x128xf32, #tpu.memory_space<vmem>>, vector<1x4x128xf32>
    %40 = vector.shape_cast %39 : vector<1x4x128xf32> to vector<4x128xf32>
    %cst_22 = arith.constant dense<0.000000e+00> : vector<16x128xf32>
    %41 = tpu.matmul %38, %40, %cst_22 {dimension_numbers = #tpu.dot_dimension_numbers<[1], [0], [0], [1], [0, 0, 1, 1], [], []>} : vector<16x4xf32>, vector<4x128xf32>, vector<16x128xf32> -> vector<16x128xf32>
    %42 = arith.addf %37, %41 : vector<16x128xf32>
    %c0_23 = arith.constant 0 : index
    %c0_24 = arith.constant 0 : index
    %43 = vector.load %arg6[%c0_23, %c0_24] : memref<1x128xf32, #tpu.memory_space<vmem>>, vector<1x128xf32>
    %44 = vector.broadcast %43 : vector<1x128xf32> to vector<16x128xf32>
    %45 = arith.addf %42, %44 : vector<16x128xf32>
    %c0_25 = arith.constant 0 : index
    %c0_26 = arith.constant 0 : index
    %c0_27 = arith.constant 0 : index
    %46 = vector.load %arg7[%c0_25, %c0_26, %c0_27] : memref<1x16x128xf32, #tpu.memory_space<vmem>>, vector<1x16x128xf32>
    %47 = vector.shape_cast %46 : vector<1x16x128xf32> to vector<16x128xf32>
    %48 = vector.shape_cast %45 : vector<16x128xf32> to vector<1x16x128xf32>
    tpu.vector_store %arg7[%c0_25, %c0_26, %c0_27], %48 {strides = array<i32>} : memref<1x16x128xf32, #tpu.memory_space<vmem>>, vector<1x16x128xf32>,
    return
  }
  func.func @transform_0(%arg0: i32, %arg1: i32) -> (i32, i32, i32) {
    %c0_i32 = arith.constant 0 : i32
    %c0_i32_0 = arith.constant 0 : i32
    return %arg0, %arg1, %c0_i32 : i32, i32, i32
  }
  func.func @transform_1(%arg0: i32, %arg1: i32) -> (i32, i32, i32) {
    %c2_i32 = arith.constant 2 : i32
    %0 = arith.muli %arg1, %c2_i32 : i32
    %c1_i32 = arith.constant 1 : i32
    %1 = arith.subi %0, %c1_i32 : i32
    %c0_i32 = arith.constant 0 : i32
    %2 = arith.maxsi %1, %c0_i32 : i32
    %c0_i32_0 = arith.constant 0 : i32
    %c0_i32_1 = arith.constant 0 : i32
    return %arg0, %2, %c0_i32_0 : i32, i32, i32
  }
  func.func @transform_2(%arg0: i32, %arg1: i32) -> (i32, i32, i32) {
    %c1_i32 = arith.constant 1 : i32
    %0 = arith.addi %arg1, %c1_i32 : i32
    %c2_i32 = arith.constant 2 : i32
    %1 = arith.muli %0, %c2_i32 : i32
    %c5_i32 = arith.constant 5 : i32
    %2 = arith.minsi %1, %c5_i32 : i32
    %c0_i32 = arith.constant 0 : i32
    %c0_i32_0 = arith.constant 0 : i32
    return %arg0, %2, %c0_i32 : i32, i32, i32
  }
  func.func @transform_3(%arg0: i32, %arg1: i32) -> (i32, i32, i32) {
    %c0_i32 = arith.constant 0 : i32
    %c0_i32_0 = arith.constant 0 : i32
    %c0_i32_1 = arith.constant 0 : i32
    %c0_i32_2 = arith.constant 0 : i32
    return %c0_i32, %c0_i32_0, %c0_i32_1 : i32, i32, i32
  }
  func.func @transform_4(%arg0: i32, %arg1: i32) -> (i32, i32) {
    %c0_i32 = arith.constant 0 : i32
    %c0_i32_0 = arith.constant 0 : i32
    %c0_i32_1 = arith.constant 0 : i32
    return %c0_i32, %c0_i32_0 : i32, i32
  }
  func.func @transform_5(%arg0: i32, %arg1: i32) -> (i32, i32, i32) {
    %c0_i32 = arith.constant 0 : i32
    %c0_i32_0 = arith.constant 0 : i32
    return %arg0, %arg1, %c0_i32 : i32, i32, i32
  }
}

module attributes {stable_mosaic.version = 11 : i64} {
  func.func @_multiscale_kernel(%arg0: i32, %arg1: i32, %arg2: memref<1x16x4xf32, #tpu.memory_space<vmem>>, %arg3: memref<1x8x4xf32, #tpu.memory_space<vmem>>, %arg4: memref<1x8x4xf32, #tpu.memory_space<vmem>>, %arg5: memref<5x4x128xf32, #tpu.memory_space<vmem>>, %arg6: memref<1x128xf32, #tpu.memory_space<vmem>>, %arg7: memref<1x16x128xf32, #tpu.memory_space<vmem>>) attributes {dimension_semantics = [#tpu.dimension_semantics<parallel>, #tpu.dimension_semantics<parallel>], iteration_bounds = array<i64: 2, 3>, scalar_prefetch = 0 : i64, scratch_operands = 0 : i64, tpu.core_type = #tpu.core_type<tc>, window_params = [{transform_indices = @transform_0, window_bounds = array<i64: 1, 16, 4>}, {transform_indices = @transform_1, window_bounds = array<i64: 1, 8, 4>}, {transform_indices = @transform_2, window_bounds = array<i64: 1, 8, 4>}, {pipeline_mode = #tpu.pipeline_mode<synchronous>, transform_indices = @transform_3, window_bounds = array<i64: 5, 4, 128>}, {pipeline_mode = #tpu.pipeline_mode<synchronous>, transform_indices = @transform_4, window_bounds = array<i64: 1, 128>}, {transform_indices = @transform_5, window_bounds = array<i64: 1, 16, 128>}]} {
    %c0 = arith.constant 0 : index
    %c0_0 = arith.constant 0 : index
    %c0_1 = arith.constant 0 : index
    %0 = vector.load %arg2[%c0, %c0_0, %c0_1] : memref<1x16x4xf32, #tpu.memory_space<vmem>>, vector<1x16x4xf32>
    %1 = vector.shape_cast %0 : vector<1x16x4xf32> to vector<16x4xf32>
    %c0_i32 = arith.constant 0 : i32
    %2 = arith.cmpi sgt, %arg1, %c0_i32 : i32
    %3 = arith.extui %2 : i1 to i32
    %4 = arith.sitofp %3 : i32 to f32
    %c2_i32 = arith.constant 2 : i32
    %5 = arith.cmpi slt, %arg1, %c2_i32 : i32
    %6 = arith.extui %5 : i1 to i32
    %7 = arith.sitofp %6 : i32 to f32
    %c0_2 = arith.constant 0 : index
    %c6 = arith.constant 6 : index
    %c0_3 = arith.constant 0 : index
    %8 = vector.load %arg3[%c0_2, %c6, %c0_3] : memref<1x8x4xf32, #tpu.memory_space<vmem>>, vector<1x2x4xf32>
    %9 = vector.shape_cast %8 : vector<1x2x4xf32> to vector<2x4xf32>
    %10 = vector.broadcast %4 : f32 to vector<2x4xf32>
    %11 = arith.mulf %9, %10 : vector<2x4xf32>
    %c0_4 = arith.constant 0 : index
    %c0_5 = arith.constant 0 : index
    %c0_6 = arith.constant 0 : index
    %12 = vector.load %arg4[%c0_4, %c0_5, %c0_6] : memref<1x8x4xf32, #tpu.memory_space<vmem>>, vector<1x2x4xf32>
    %13 = vector.shape_cast %12 : vector<1x2x4xf32> to vector<2x4xf32>
    %14 = vector.broadcast %7 : f32 to vector<2x4xf32>
    %15 = arith.mulf %13, %14 : vector<2x4xf32>
    %16 = tpu.concatenate %11, %1, %15 in 0 : vector<2x4xf32>, vector<16x4xf32>, vector<2x4xf32> -> vector<20x4xf32>
    %cst = arith.constant 0.000000e+00 : f32
    %17 = vector.broadcast %cst : f32 to vector<16x128xf32>
    %18 = vector.extract_strided_slice %16 {offsets = [0, 0], sizes = [16, 4], strides = [1, 1]} : vector<20x4xf32> to vector<16x4xf32>
    %c0_7 = arith.constant 0 : index
    %c0_8 = arith.constant 0 : index
    %c0_9 = arith.constant 0 : index
    %19 = vector.load %arg5[%c0_7, %c0_8, %c0_9] : memref<5x4x128xf32, #tpu.memory_space<vmem>>, vector<1x4x128xf32>
    %20 = vector.shape_cast %19 : vector<1x4x128xf32> to vector<4x128xf32>
    %cst_10 = arith.constant dense<0.000000e+00> : vector<16x128xf32>
    %21 = tpu.matmul %18, %20, %cst_10 {dimension_numbers = #tpu.dot_dimension_numbers<[1], [0], [0], [1], [0, 0, 1, 1], [], []>} : vector<16x4xf32>, vector<4x128xf32>, vector<16x128xf32> -> vector<16x128xf32>
    %22 = arith.addf %17, %21 : vector<16x128xf32>
    %23 = vector.extract_strided_slice %16 {offsets = [1, 0], sizes = [16, 4], strides = [1, 1]} : vector<20x4xf32> to vector<16x4xf32>
    %c1 = arith.constant 1 : index
    %c0_11 = arith.constant 0 : index
    %c0_12 = arith.constant 0 : index
    %24 = vector.load %arg5[%c1, %c0_11, %c0_12] : memref<5x4x128xf32, #tpu.memory_space<vmem>>, vector<1x4x128xf32>
    %25 = vector.shape_cast %24 : vector<1x4x128xf32> to vector<4x128xf32>
    %cst_13 = arith.constant dense<0.000000e+00> : vector<16x128xf32>
    %26 = tpu.matmul %23, %25, %cst_13 {dimension_numbers = #tpu.dot_dimension_numbers<[1], [0], [0], [1], [0, 0, 1, 1], [], []>} : vector<16x4xf32>, vector<4x128xf32>, vector<16x128xf32> -> vector<16x128xf32>
    %27 = arith.addf %22, %26 : vector<16x128xf32>
    %28 = vector.extract_strided_slice %16 {offsets = [2, 0], sizes = [16, 4], strides = [1, 1]} : vector<20x4xf32> to vector<16x4xf32>
    %c2 = arith.constant 2 : index
    %c0_14 = arith.constant 0 : index
    %c0_15 = arith.constant 0 : index
    %29 = vector.load %arg5[%c2, %c0_14, %c0_15] : memref<5x4x128xf32, #tpu.memory_space<vmem>>, vector<1x4x128xf32>
    %30 = vector.shape_cast %29 : vector<1x4x128xf32> to vector<4x128xf32>
    %cst_16 = arith.constant dense<0.000000e+00> : vector<16x128xf32>
    %31 = tpu.matmul %28, %30, %cst_16 {dimension_numbers = #tpu.dot_dimension_numbers<[1], [0], [0], [1], [0, 0, 1, 1], [], []>} : vector<16x4xf32>, vector<4x128xf32>, vector<16x128xf32> -> vector<16x128xf32>
    %32 = arith.addf %27, %31 : vector<16x128xf32>
    %33 = vector.extract_strided_slice %16 {offsets = [3, 0], sizes = [16, 4], strides = [1, 1]} : vector<20x4xf32> to vector<16x4xf32>
    %c3 = arith.constant 3 : index
    %c0_17 = arith.constant 0 : index
    %c0_18 = arith.constant 0 : index
    %34 = vector.load %arg5[%c3, %c0_17, %c0_18] : memref<5x4x128xf32, #tpu.memory_space<vmem>>, vector<1x4x128xf32>
    %35 = vector.shape_cast %34 : vector<1x4x128xf32> to vector<4x128xf32>
    %cst_19 = arith.constant dense<0.000000e+00> : vector<16x128xf32>
    %36 = tpu.matmul %33, %35, %cst_19 {dimension_numbers = #tpu.dot_dimension_numbers<[1], [0], [0], [1], [0, 0, 1, 1], [], []>} : vector<16x4xf32>, vector<4x128xf32>, vector<16x128xf32> -> vector<16x128xf32>
    %37 = arith.addf %32, %36 : vector<16x128xf32>
    %38 = vector.extract_strided_slice %16 {offsets = [4, 0], sizes = [16, 4], strides = [1, 1]} : vector<20x4xf32> to vector<16x4xf32>
    %c4 = arith.constant 4 : index
    %c0_20 = arith.constant 0 : index
    %c0_21 = arith.constant 0 : index
    %39 = vector.load %arg5[%c4, %c0_20, %c0_21] : memref<5x4x128xf32, #tpu.memory_space<vmem>>, vector<1x4x128xf32>
    %40 = vector.shape_cast %39 : vector<1x4x128xf32> to vector<4x128xf32>
    %cst_22 = arith.constant dense<0.000000e+00> : vector<16x128xf32>
    %41 = tpu.matmul %38, %40, %cst_22 {dimension_numbers = #tpu.dot_dimension_numbers<[1], [0], [0], [1], [0, 0, 1, 1], [], []>} : vector<16x4xf32>, vector<4x128xf32>, vector<16x128xf32> -> vector<16x128xf32>
    %42 = arith.addf %37, %41 : vector<16x128xf32>
    %c0_23 = arith.constant 0 : index
    %c0_24 = arith.constant 0 : index
    %43 = vector.load %arg6[%c0_23, %c0_24] : memref<1x128xf32, #tpu.memory_space<vmem>>, vector<1x128xf32>
    %44 = vector.broadcast %43 : vector<1x128xf32> to vector<16x128xf32>
    %45 = arith.addf %42, %44 : vector<16x128xf32>
    %c0_25 = arith.constant 0 : index
    %c0_26 = arith.constant 0 : index
    %c0_27 = arith.constant 0 : index
    %46 = vector.load %arg7[%c0_25, %c0_26, %c0_27] : memref<1x16x128xf32, #tpu.memory_space<vmem>>, vector<1x16x128xf32>
    %47 = vector.shape_cast %46 : vector<1x16x128xf32> to vector<16x128xf32>
    %48 = vector.shape_cast %45 : vector<16x128xf32> to vector<1x16x128xf32>
    tpu.vector_store %arg7[%c0_25, %c0_26, %c0_27], %48 {strides = array<i32>} : memref<1x16x128xf32, #tpu.memory_space<vmem>>, vector<1x16x128xf32>,
    return
  }
  func.func @transform_0(%arg0: i32, %arg1: i32) -> (i32, i32, i32) {
    %c0_i32 = arith.constant 0 : i32
    %c0_i32_0 = arith.constant 0 : i32
    return %arg0, %arg1, %c0_i32 : i32, i32, i32
  }
  func.func @transform_1(%arg0: i32, %arg1: i32) -> (i32, i32, i32) {
    %c2_i32 = arith.constant 2 : i32
    %0 = arith.muli %arg1, %c2_i32 : i32
    %c1_i32 = arith.constant 1 : i32
    %1 = arith.subi %0, %c1_i32 : i32
    %c0_i32 = arith.constant 0 : i32
    %2 = arith.maxsi %1, %c0_i32 : i32
    %c0_i32_0 = arith.constant 0 : i32
    %c0_i32_1 = arith.constant 0 : i32
    return %arg0, %2, %c0_i32_0 : i32, i32, i32
  }
  func.func @transform_2(%arg0: i32, %arg1: i32) -> (i32, i32, i32) {
    %c1_i32 = arith.constant 1 : i32
    %0 = arith.addi %arg1, %c1_i32 : i32
    %c2_i32 = arith.constant 2 : i32
    %1 = arith.muli %0, %c2_i32 : i32
    %c5_i32 = arith.constant 5 : i32
    %2 = arith.minsi %1, %c5_i32 : i32
    %c0_i32 = arith.constant 0 : i32
    %c0_i32_0 = arith.constant 0 : i32
    return %arg0, %2, %c0_i32 : i32, i32, i32
  }
  func.func @transform_3(%arg0: i32, %arg1: i32) -> (i32, i32, i32) {
    %c0_i32 = arith.constant 0 : i32
    %c0_i32_0 = arith.constant 0 : i32
    %c0_i32_1 = arith.constant 0 : i32
    %c0_i32_2 = arith.constant 0 : i32
    return %c0_i32, %c0_i32_0, %c0_i32_1 : i32, i32, i32
  }
  func.func @transform_4(%arg0: i32, %arg1: i32) -> (i32, i32) {
    %c0_i32 = arith.constant 0 : i32
    %c0_i32_0 = arith.constant 0 : i32
    %c0_i32_1 = arith.constant 0 : i32
    return %c0_i32, %c0_i32_0 : i32, i32
  }
  func.func @transform_5(%arg0: i32, %arg1: i32) -> (i32, i32, i32) {
    %c0_i32 = arith.constant 0 : i32
    %c0_i32_0 = arith.constant 0 : i32
    return %arg0, %arg1, %c0_i32 : i32, i32, i32
  }
}

</mosaic_0001>

<bundles_post_ra>
// kernel: tpu_custom_call.1
= control target key start
LH: loop header
LB: loop body
LE: loop exit
PB: predicated region body
PF: predicated region fallthrough
CT: control target
= control target key end

     0   :  { %10 = vsyncpa [#allocation3], 0  ;;  %s1531_s0 = inlined_call_operand.vmem [shape: f32[2,48,4], index: 0, kind: input, shape index: {}]   ;;  %s1532_s1 = inlined_call_operand.vmem [shape: f32[2,48,4], index: 1, kind: input, shape index: {}]   ;;  %s1533_s2 = inlined_call_operand.vmem [shape: f32[2,48,4], index: 2, kind: input, shape index: {}]   ;;  %s1534_s3 = inlined_call_operand.vmem [shape: f32[5,4,128], index: 3, kind: input, shape index: {}]   ;;  %s1535_s4 = inlined_call_operand.vmem [shape: f32[1,128], index: 4, kind: input, shape index: {}]   ;;  %s1536_s5 = inlined_call_operand.hbm [shape: f32[2,48,128], index: 5, kind: output, shape index: {}]  }
   0x1   :  { %12 = vsyncpa [#allocation3 + $0x1], 0  ;;  %s1308_s18 = smov 0   ;;  %s1310_s19 = smov 0  }
   0x2   :  { %s1312_s20 = smov 0   ;;  %s1314_s21 = smov 0  }
   0x3   :  { %s1316_s22 = smov 0   ;;  %s1318_s23 = smov 0  }
   0x4   :  { %s1320_s24 = smov 0   ;;  %s1322_s25 = smov 0  }
   0x5 LB: > { %s996_s26 = sadd.s32 4294967295, %s1273_s25   ;;  %s997_s27 = sadd.s32 4294967294, %s1273_s25   ;;  %s1273_s25 = sphi %s1322_s25, %s18_s25   ;;  %s1269_s24 = sphi %s1320_s24, %s1546_s24   ;;  %s1265_s23 = sphi %s1318_s23, %s1545_s23   ;;  %s1261_s22 = sphi %s1316_s22, %s1544_s22   ;;  %s1257_s21 = sphi %s1314_s21, %s1543_s21   ;;  %s1253_s20 = sphi %s1312_s20, %s1542_s20   ;;  %s1249_s19 = sphi %s1310_s19, %s1541_s19   ;;  %s1245_s18 = sphi %s1308_s18, %s1540_s18  }
   0x6   : > { %s27_s28 = sadd.s32 1, %s1265_s23  ;;  %s30_s29 = sadd.s32 1, %s1269_s24 }
   0x7   : > { %p28_p0 = scmp.ge.s32.totalorder %s27_s28, 3  ;;  %p191_p1 = scmp.ne.s32.totalorder %s1253_s20, %s1249_s19 }
   0x8   : > { %p192_p2 = scmp.eq.s32.totalorder %s996_s26, 5  ;;  %p197_p5 = scmp.ne.s32.totalorder %s1249_s19, %s1245_s18 }
   0x9   : > { %s1548_s28 = smov (%p28_p0, %s27_s28), 0  ;;  %s1550_s29 = smov (!%p28_p0, %s30_s29), %s1269_s24 }
   0xa   : > { %s177_s30 = ssub.s32 %s1265_s23, %s1548_s28  ;;  %p1359_p3 = por %p192_p2, %p191_p1 }
   0xb   : > { %p32_p4 = scmp.ge.s32.totalorder %s1550_s29, 2  ;;  %p198_p6 = scmp.eq.s32.totalorder %s997_s27, 5 }
   0xc   : > { %p1006_p7 = scmp.ge.s32.totalorder %s1273_s25, 1  ;;  %p273_p9 = scmp.lt.s32.totalorder %s1273_s25, 7 }
   0xd   : > { %s1552_s29 = smov (%p32_p4, %s1550_s29), 0  ;;  %p1368_p8 = por %p198_p6, %p197_p5 }
   0xe   : > { %s176_s8 = ssub.s32 %s1269_s24, %s1552_s29  ;;  %s181_s9 = sadd.s32 1, %s1253_s20 }
   0xf   : > { %s178_s10 = sor.u32 %s177_s30, %s176_s8  ;;  %p274_p10 = pnand %p1006_p7, %p273_p9 }
  0x10   : > { %p179_p11 = scmp.eq.s32.totalorder %s178_s10, 0  ;;  %vm415_vm0 = vcmask (!%p274_p10), 1043456   ;;  %v1030_v0 = vld [vmem:[%s1534_s3 + $0x8] sm:$0xf] (!%p274_p10)  ;;  %v1023_v1 = vld [vmem:[%s1534_s3 + $0x4] sm:$0xf] (!%p274_p10) }
  0x11   : > { %277 = sbr.rel (%p274_p10) target bundleno = 294 (0x126), region = 40  ;;  %s1386_s16 = sshll.u32 (!%p274_p10), %s1257_s21, 1  ;;  %1081 = vmatprep.subr.msk.mxu0 (!%p274_p10), %vm415_vm0, %v1030_v0  ;;  %1071 = vmatprep.subr.msk.mxu1 (!%p274_p10), %vm415_vm0, %v1023_v1  ;;  %v1398_v2 = vld [vmem:[%s1534_s3 + $0xc] sm:$0xf] (!%p274_p10)  ;;  %v1403_v3 = vld [vmem:[%s1534_s3] sm:$0xf] (!%p274_p10) }
  0x12   : > { %s1377_s11 = scalar_select %p179_p11, %s1253_s20, %s181_s9  }
  0x13   : > { %p330_p12 = scmp.lt.s32.totalorder (!%p274_p10), %s1261_s22, 1  ;;  %p332_p13 = scmp.lt.s32.totalorder (!%p274_p10), %s1386_s16, 5  ;;  %1082 = vmatpush3.msk.msra.mxu0 (!%p274_p10), %vm415_vm0, %v1030_v0  ;;  %1072 = vmatpush3.msk.msra.mxu1 (!%p274_p10), %vm415_vm0, %v1023_v1  ;;  %vm388_vm1 = vcmask (!%p274_p10), 1041408   ;;  %vm404_vm2 = vcmask (!%p274_p10), 1046528   ;;  %vm578_vm3 = vcmask (!%p274_p10), 1045504   ;;  %vm410_vm4 = vcmask (!%p274_p10), 31744  }
  0x14   : > { %s1011_s17 = sadd.s32 (!%p274_p10), 4294967295, %s1386_s16  ;;  %1086 = vmatprep.subr.msk.mxu0 (!%p274_p10), %vm415_vm0, %v1398_v2  ;;  %1076 = vmatprep.subr.msk.mxu1 (!%p274_p10), %vm415_vm0, %v1403_v3  ;;  %p374_p1 = scmp.gt.s32.totalorder (!%p274_p10), %s1257_s21, 0  ;;  %vm670_vm5 = vcmask (!%p274_p10), 1044480   ;;  %v1038_v31 = vld [vmem:[%s1534_s3 + $0x10] sm:$0xf] (!%p274_p10) }
  0x15   : > { %p341_p0 = scmp.gt.s32.totalorder (!%p274_p10), %s1011_s17, 0  ;;  %p1012_p2 = scmp.lt.s32.totalorder (!%p274_p10), %s1011_s17, 5  ;;  %v1042_v42 = vld [vmem:[%s1535_s4] ss:$0 sm:$0xff] (!%p274_p10) }
  0x16   : > { %s1055_s30 = sadd.s32 (!%p274_p10), 2, %s1386_s16  ;;  %p377_p5 = scmp.lt.s32.totalorder (!%p274_p10), %s1257_s21, 2 }
  0x17   : > { %p1419_p4 = scmp.lt.s32.totalorder (!%p274_p10), %s1055_s30, 5  ;;  %s1105_s26 = smul.u32 (!%p274_p10), 6, %s1261_s22 }
  0x18   : > { %s331_s9 = scalar_select %p330_p12, %s1261_s22, 1 }
  0x19   : > { %s333_s10 = scalar_select %p332_p13, %s1386_s16, 5 }
  0x1a   : > { %s1411_s12 = smul.u32 6, %s331_s9  ;;  %s1554_s17 = smov (!%p341_p0, %s1011_s17), 0 }
  0x1b   : > { %s375_s8 = scalar_select %p374_p1, 1, 0 }
  0x1c   : > { %s335_s13 = sadd.s32 %s1411_s12, %s333_s10  ;;  %s1556_s17 = smov (!%p1012_p2, %s1554_s17), 5 }
  0x1d   : > { %s1009_s14 = sshll.u32 %s335_s13, 3  ;;  %s376_s9 = scvt.s32.f32 %s375_s8 }
  0x1e   : > { %s337_s27 = scalar_lea.vmem %s1531_s0, %s1009_s14  ;;  %s348_s13 = sadd.s32 %s1411_s12, %s1556_s17 }
  0x1f   : > { %v372_v4 = vld [vmem:[%s337_s27] sm:$0xff]  ;;  %v373_v5 = vld [vmem:[%s337_s27 + $0x8] sm:$0xff]  ;;  %s1017_s15 = sshll.u32 %s348_s13, 3  ;;  %v381_v8 = vstv %s376_s9  ;;  %s1558_s30 = smov (!%p1419_p4, %s1055_s30), 5 }
  0x20   : > { %v389_v6 = vrot.slane %v372_v4, 6  ;;  %v390_v7 = vrot.slane %v373_v5, 6  ;;  %s350_s27 = scalar_lea.vmem %s1532_s1, %s1017_s15  ;;  %s1560_s30 = smov (!%p1419_p4, %s1558_s30), 5 }
  0x21   : > { %v380_v10 = vld [vmem:[%s350_s27 + $0x6] sm:$0x3]  ;;  %s378_s8 = scalar_select %p377_p5, 1, 0 }
  0x22   : > { %v391_v9 = vsel %vm388_vm1, %v389_v6, %v390_v7  ;;  %v382_v11 = vmul.f32 %v381_v8, %v380_v10  ;;  %s364_s17 = sadd.s32 %s1411_s12, %s1560_s30  ;;  %s326_s14 = sand.u32 1, %s1249_s19  }
  0x23   : > { %v406_v12 = vrot.slane %v391_v9, 1  ;;  %v580_v13 = vrot.slane %v391_v9, 2  ;;  %s379_s21 = scvt.s32.f32 %s378_s8  ;;  %s1022_s9 = sshll.u32 %s364_s17, 3  ;;  %v672_v24 = vrot.slane %v391_v9, 3  ;;  %v763_v34 = vrot.slane %v391_v9, 4 }
  0x24   : > { %v397_v14 = vsel %vm388_vm1, %v382_v11, %v389_v6  ;;  %s366_s10 = scalar_lea.vmem %s1533_s2, %s1022_s9  ;;  %s1007_s27 = sshll.u32 %s326_s14, 4 }
  0x25   : > { %v405_v15 = vrot.slane %v397_v14, 1  ;;  %v579_v16 = vrot.slane %v397_v14, 2  ;;  %v384_v17 = vstv %s379_s21  ;;  %v383_v20 = vld [vmem:[%s366_s10] sm:$0x3]  ;;  %v671_v23 = vrot.slane %v397_v14, 3  ;;  %s875_s8 = sadd.s32 %s1105_s26, %s1386_s16  ;;  %s328_s9 = scalar_lea.vmem [#allocation2], %s1007_s27 }
  0x26   : > { %v385_v21 = vmul.f32 %v384_v17, %v383_v20  ;;  %v762_v33 = vrot.slane %v397_v14, 4  ;;  %s878_s13 = sshll.u32 %s328_s9, 4  ;;  %s1045_s15 = sshll.u32 %s875_s8, 7  ;;  %s1472_s13 = int_to_ptr.vmem [resolvable:$true] %s878_s13 }
  0x27   : > { %v407_v18 = vsel %vm404_vm2, %v405_v15, %v406_v12  ;;  %v581_v19 = vsel %vm578_vm3, %v579_v16, %v580_v13  ;;  %v673_v30 = vsel %vm670_vm5, %v671_v23, %v672_v24  ;;  %s1477_s22 = scalar_lea.hbm %s1536_s5, %s1045_s15  ;;  %s1479_s16 = scalar_lea.sflag [#allocation3], %s326_s14 }
  0x28   : > { %1073 = vmatprep.mubr.msk.f32.mxu1 %vm410_vm4, %v407_v18  ;;  %1083 = vmatprep.mubr.msk.f32.mxu0 %vm410_vm4, %v581_v19  ;;  %v395_v22 = vrot.slane %v385_v21, 6  ;;  %v764_v36 = vsel %vm415_vm0, %v762_v33, %v763_v34  ;;  %s1179_s30 = scalar_lea.vmem %s1472_s13, 256  ;;  %s1275_s26 = smov [#allocation2]  }
  0x29   : > { %p1180_p6 = scmp.ne.s32.totalorder %s1472_s13, %s1179_s30  ;;  %s1183_s27 = sshll.u32 %s1275_s26, 4  ;;  %s1184_s27 = int_to_ptr.vmem [resolvable:$false] %s1183_s27 }
  0x2a   : > { %v398_v25 = vsel %vm388_vm1, %v390_v7, %v395_v22  ;;  %s1185_s8 = scalar_lea.vmem %s1184_s27, 512  ;;  %p1186_p10 = scmp.lt.s32.totalorder %s1472_s13, %s1184_s27 }
  0x2b   : > { %v408_v26 = vrot.slane %v398_v25, 1  ;;  %v582_v27 = vrot.slane %v398_v25, 2  ;;  %v674_v32 = vrot.slane %v398_v25, 3  ;;  %v765_v37 = vrot.slane %v398_v25, 4  ;;  %p1181_p7 = pnand %p1180_p6, %p1359_p3  ;;  %p1187_p11 = scmp.lt.s32.totalorder %s1185_s8, %s1179_s30 }
  0x2d   : > { %v409_v28 = vsel %vm404_vm2, %v406_v12, %v408_v26  ;;  %v583_v29 = vsel %vm578_vm3, %v580_v13, %v582_v27  ;;  %v675_v35 = vsel %vm670_vm5, %v672_v24, %v674_v32  ;;  %v766_v38 = vsel %vm415_vm0, %v763_v34, %v765_v37  ;;  %p1182_p9 = pneg %p1181_p7  ;;  %p1188_p12 = por %p1187_p11, %p1186_p10 }
  0x2e   : > { %1074 = vmatmul.mubr.msk.f32.vlgmr.msra.gmra.mrb[0].mxu1 %vm410_vm4, %v409_v28  ;;  %1084 = vmatmul.mubr.msk.f32.vlgmr.msra.gmra.mrb[0].mxu0 %vm410_vm4, %v583_v29 }
  0x2f   : > { %1087 = vmatpush3.msk.msra.mxu0 %vm415_vm0, %v1398_v2  ;;  %1077 = vmatpush3.msk.msra.mxu1 %vm415_vm0, %v1403_v3  ;;  %p1189_p13 = pnand %p1188_p12, %p1182_p9 }
  0x30   : > { %1078 = vmatprep.mubr.msk.f32.mxu1 %vm410_vm4, %v397_v14  ;;  %1088 = vmatprep.mubr.msk.f32.mxu0 %vm410_vm4, %v673_v30 }
  0x31   : > { %1091 = vmatprep.subr.msk.mxu0 %vm415_vm0, %v1038_v31 }
  0x36   : > { %1079 = vmatmul.mubr.msk.f32.vlgmr.msra.gmra.mrb[0].mxu1 %vm410_vm4, %v391_v9  ;;  %1089 = vmatmul.mubr.msk.f32.vlgmr.msra.gmra.mrb[0].mxu0 %vm410_vm4, %v675_v35 }
  0x37   : > { %1092 = vmatpush3.msk.msra.mxu0 %vm415_vm0, %v1038_v31  ;;  %1093 = vmatprep.mubr.msk.f32.mxu0 %vm410_vm4, %v764_v36 }
  0x3e   : > { %1094 = vmatmul.mubr.msk.f32.vlgmr.msra.gmra.mrb[0].mxu0 %vm410_vm4, %v766_v38 }
 0x109   : > { %v1080_v39 = vpop.f32.mrb[0].mxu1 }
 0x10a   : > { %v567_v40 = vpop.f32.mrb[1].mxu1 }
 0x111   : > { %v1095_v41 = vpop.f32.mrb[0].mxu0 }
 0x112   : > { %v1096_v43 = vadd.f32 %v1095_v41, %v1080_v39  ;;  %v840_v44 = vpop.f32.mrb[1].mxu0 }
 0x113   : > { %v1097_v45 = vadd.f32 %v840_v44, %v567_v40 }
 0x114   : > { %v859_v46 = vadd.f32 %v1096_v43, %v1042_v42 }
 0x115   : > { %v858_v47 = vadd.f32 %v1097_v45, %v1042_v42 }
 0x116   : > { %861 = vst [vmem:[%s328_s9 + $0x8] sm:$0xff] %v859_v46 }
 0x117   : > { %860 = vst [vmem:[%s328_s9] sm:$0xff] %v858_v47 }
 0x118   : > { %1192 = shalt.err (!%p1189_p13)
}
 0x119   : > { %s1193_s14 = scalar_lea.hbm %s1477_s22, 256  ;;  %s1197_s9 = scalar_lea.hbm %s1536_s5, 1536 }
 0x11a   : > { %p1194_p0 = scmp.ne.s32.totalorder %s1477_s22, %s1193_s14  ;;  %p1198_p4 = scmp.lt.u32.totalorder %s1477_s22, %s1536_s5 }
 0x11b   : > { %p1199_p5 = scmp.lt.u32.totalorder %s1197_s9, %s1193_s14  ;;  %p1201_p7 = scmp.lt.u32.totalorder %s1193_s14, %s1477_s22 }
 0x11c   : > { %p1195_p1 = pnand %p1194_p0, %p1359_p3 }
 0x11d   : > { %p1200_p6 = por %p1199_p5, %p1198_p4 }
 0x11e   : > { %p1196_p2 = pneg %p1195_p1 }
 0x11f   : > { %p1202_p9 = por %p1201_p7, %p1200_p6 }
 0x121   : > { %p1203_p10 = pnand %p1202_p9, %p1196_p2 }
 0x123   : > { %1206 = shalt.err (!%p1203_p10)
}
 0x124   : > { %s1276_s12 = smov 128   ;;  %s1277_s30 = smov 8  }
 0x125   : > { %1106 = dma.vmem_to_hbm [thread:$0]  (%p1359_p3), %s1472_s13, 256, %s1477_s22, %s1479_s16, %s1276_s12, %s1276_s12, %s1277_s30  }
 0x126 PF: > { %p1112_p11 = scmp.ge.s32.totalorder %s1273_s25, 2  ;;  %s893_s26 = sand.u32 1, %s1245_s18  }
 0x127   : > { %s894_s27 = scalar_lea.sflag [#allocation3], %s893_s26 }
 0x128   : > { %p1109_p12 = pnand %p1112_p11, %p1368_p8 }
 0x12a   : > { %1240 = dma.done.wait (!%p1109_p12), %s894_s27, 256  }
 0x12b   : > { %1242 = vsyncadd (!%p1109_p12), %s894_s27, 4294967040  ;;  %s18_s25 = sadd.s32 1, %s1273_s25   ;;  %s1540_s18 = smov %s1249_s19 }
 0x12c   : > { %p15_p13 = scmp.ge.s32.totalorder %s18_s25, 8   ;;  %s1541_s19 = smov %s1253_s20 }
 0x12d   : > { %s1542_s20 = smov %s1377_s11  ;;  %s1543_s21 = smov %s1265_s23 }
 0x12e   : > { %s1544_s22 = smov %s1269_s24  ;;  %s1545_s23 = smov %s1548_s28 }
 0x12f   : > { %s1546_s24 = smov %s1552_s29  ;;  %17 = sbr.rel (!%p15_p13) target bundleno = 5 (0x5), region = 85 }
 0x136   :  { %899 = vsyncpa [#allocation3], 1 }
 0x137   :  { %901 = vsyncpa [#allocation3 + $0x1], 1 }

// kernel: tpu_custom_call.1
= control target key start
LH: loop header
LB: loop body
LE: loop exit
PB: predicated region body
PF: predicated region fallthrough
CT: control target
= control target key end

     0   :  { %10 = vsyncpa [#allocation3], 0  ;;  %s1531_s0 = inlined_call_operand.vmem [shape: f32[2,48,4], index: 0, kind: input, shape index: {}]   ;;  %s1532_s1 = inlined_call_operand.vmem [shape: f32[2,48,4], index: 1, kind: input, shape index: {}]   ;;  %s1533_s2 = inlined_call_operand.vmem [shape: f32[2,48,4], index: 2, kind: input, shape index: {}]   ;;  %s1534_s3 = inlined_call_operand.vmem [shape: f32[5,4,128], index: 3, kind: input, shape index: {}]   ;;  %s1535_s4 = inlined_call_operand.vmem [shape: f32[1,128], index: 4, kind: input, shape index: {}]   ;;  %s1536_s5 = inlined_call_operand.hbm [shape: f32[2,48,128], index: 5, kind: output, shape index: {}]  }
   0x1   :  { %12 = vsyncpa [#allocation3 + $0x1], 0  ;;  %s1308_s18 = smov 0   ;;  %s1310_s19 = smov 0  }
   0x2   :  { %s1312_s20 = smov 0   ;;  %s1314_s21 = smov 0  }
   0x3   :  { %s1316_s22 = smov 0   ;;  %s1318_s23 = smov 0  }
   0x4   :  { %s1320_s24 = smov 0   ;;  %s1322_s25 = smov 0  }
   0x5 LB: > { %s996_s26 = sadd.s32 4294967295, %s1273_s25   ;;  %s997_s27 = sadd.s32 4294967294, %s1273_s25   ;;  %s1273_s25 = sphi %s1322_s25, %s18_s25   ;;  %s1269_s24 = sphi %s1320_s24, %s1546_s24   ;;  %s1265_s23 = sphi %s1318_s23, %s1545_s23   ;;  %s1261_s22 = sphi %s1316_s22, %s1544_s22   ;;  %s1257_s21 = sphi %s1314_s21, %s1543_s21   ;;  %s1253_s20 = sphi %s1312_s20, %s1542_s20   ;;  %s1249_s19 = sphi %s1310_s19, %s1541_s19   ;;  %s1245_s18 = sphi %s1308_s18, %s1540_s18  }
   0x6   : > { %s27_s28 = sadd.s32 1, %s1265_s23  ;;  %s30_s29 = sadd.s32 1, %s1269_s24 }
   0x7   : > { %p28_p0 = scmp.ge.s32.totalorder %s27_s28, 3  ;;  %p191_p1 = scmp.ne.s32.totalorder %s1253_s20, %s1249_s19 }
   0x8   : > { %p192_p2 = scmp.eq.s32.totalorder %s996_s26, 5  ;;  %p197_p5 = scmp.ne.s32.totalorder %s1249_s19, %s1245_s18 }
   0x9   : > { %s1548_s28 = smov (%p28_p0, %s27_s28), 0  ;;  %s1550_s29 = smov (!%p28_p0, %s30_s29), %s1269_s24 }
   0xa   : > { %s177_s30 = ssub.s32 %s1265_s23, %s1548_s28  ;;  %p1359_p3 = por %p192_p2, %p191_p1 }
   0xb   : > { %p32_p4 = scmp.ge.s32.totalorder %s1550_s29, 2  ;;  %p198_p6 = scmp.eq.s32.totalorder %s997_s27, 5 }
   0xc   : > { %p1006_p7 = scmp.ge.s32.totalorder %s1273_s25, 1  ;;  %p273_p9 = scmp.lt.s32.totalorder %s1273_s25, 7 }
   0xd   : > { %s1552_s29 = smov (%p32_p4, %s1550_s29), 0  ;;  %p1368_p8 = por %p198_p6, %p197_p5 }
   0xe   : > { %s176_s8 = ssub.s32 %s1269_s24, %s1552_s29  ;;  %s181_s9 = sadd.s32 1, %s1253_s20 }
   0xf   : > { %s178_s10 = sor.u32 %s177_s30, %s176_s8  ;;  %p274_p10 = pnand %p1006_p7, %p273_p9 }
  0x10   : > { %p179_p11 = scmp.eq.s32.totalorder %s178_s10, 0  ;;  %vm415_vm0 = vcmask (!%p274_p10), 1043456   ;;  %v1030_v0 = vld [vmem:[%s1534_s3 + $0x8] sm:$0xf] (!%p274_p10)  ;;  %v1023_v1 = vld [vmem:[%s1534_s3 + $0x4] sm:$0xf] (!%p274_p10) }
  0x11   : > { %277 = sbr.rel (%p274_p10) target bundleno = 294 (0x126), region = 40  ;;  %s1386_s16 = sshll.u32 (!%p274_p10), %s1257_s21, 1  ;;  %1081 = vmatprep.subr.msk.mxu0 (!%p274_p10), %vm415_vm0, %v1030_v0  ;;  %1071 = vmatprep.subr.msk.mxu1 (!%p274_p10), %vm415_vm0, %v1023_v1  ;;  %v1398_v2 = vld [vmem:[%s1534_s3 + $0xc] sm:$0xf] (!%p274_p10)  ;;  %v1403_v3 = vld [vmem:[%s1534_s3] sm:$0xf] (!%p274_p10) }
  0x12   : > { %s1377_s11 = scalar_select %p179_p11, %s1253_s20, %s181_s9  }
  0x13   : > { %p330_p12 = scmp.lt.s32.totalorder (!%p274_p10), %s1261_s22, 1  ;;  %p332_p13 = scmp.lt.s32.totalorder (!%p274_p10), %s1386_s16, 5  ;;  %1082 = vmatpush3.msk.msra.mxu0 (!%p274_p10), %vm415_vm0, %v1030_v0  ;;  %1072 = vmatpush3.msk.msra.mxu1 (!%p274_p10), %vm415_vm0, %v1023_v1  ;;  %vm388_vm1 = vcmask (!%p274_p10), 1041408   ;;  %vm404_vm2 = vcmask (!%p274_p10), 1046528   ;;  %vm578_vm3 = vcmask (!%p274_p10), 1045504   ;;  %vm410_vm4 = vcmask (!%p274_p10), 31744  }
  0x14   : > { %s1011_s17 = sadd.s32 (!%p274_p10), 4294967295, %s1386_s16  ;;  %1086 = vmatprep.subr.msk.mxu0 (!%p274_p10), %vm415_vm0, %v1398_v2  ;;  %1076 = vmatprep.subr.msk.mxu1 (!%p274_p10), %vm415_vm0, %v1403_v3  ;;  %p374_p1 = scmp.gt.s32.totalorder (!%p274_p10), %s1257_s21, 0  ;;  %vm670_vm5 = vcmask (!%p274_p10), 1044480   ;;  %v1038_v31 = vld [vmem:[%s1534_s3 + $0x10] sm:$0xf] (!%p274_p10) }
  0x15   : > { %p341_p0 = scmp.gt.s32.totalorder (!%p274_p10), %s1011_s17, 0  ;;  %p1012_p2 = scmp.lt.s32.totalorder (!%p274_p10), %s1011_s17, 5  ;;  %v1042_v42 = vld [vmem:[%s1535_s4] ss:$0 sm:$0xff] (!%p274_p10) }
  0x16   : > { %s1055_s30 = sadd.s32 (!%p274_p10), 2, %s1386_s16  ;;  %p377_p5 = scmp.lt.s32.totalorder (!%p274_p10), %s1257_s21, 2 }
  0x17   : > { %p1419_p4 = scmp.lt.s32.totalorder (!%p274_p10), %s1055_s30, 5  ;;  %s1105_s26 = smul.u32 (!%p274_p10), 6, %s1261_s22 }
  0x18   : > { %s331_s9 = scalar_select %p330_p12, %s1261_s22, 1 }
  0x19   : > { %s333_s10 = scalar_select %p332_p13, %s1386_s16, 5 }
  0x1a   : > { %s1411_s12 = smul.u32 6, %s331_s9  ;;  %s1554_s17 = smov (!%p341_p0, %s1011_s17), 0 }
  0x1b   : > { %s375_s8 = scalar_select %p374_p1, 1, 0 }
  0x1c   : > { %s335_s13 = sadd.s32 %s1411_s12, %s333_s10  ;;  %s1556_s17 = smov (!%p1012_p2, %s1554_s17), 5 }
  0x1d   : > { %s1009_s14 = sshll.u32 %s335_s13, 3  ;;  %s376_s9 = scvt.s32.f32 %s375_s8 }
  0x1e   : > { %s337_s27 = scalar_lea.vmem %s1531_s0, %s1009_s14  ;;  %s348_s13 = sadd.s32 %s1411_s12, %s1556_s17 }
  0x1f   : > { %v372_v4 = vld [vmem:[%s337_s27] sm:$0xff]  ;;  %v373_v5 = vld [vmem:[%s337_s27 + $0x8] sm:$0xff]  ;;  %s1017_s15 = sshll.u32 %s348_s13, 3  ;;  %v381_v8 = vstv %s376_s9  ;;  %s1558_s30 = smov (!%p1419_p4, %s1055_s30), 5 }
  0x20   : > { %v389_v6 = vrot.slane %v372_v4, 6  ;;  %v390_v7 = vrot.slane %v373_v5, 6  ;;  %s350_s27 = scalar_lea.vmem %s1532_s1, %s1017_s15  ;;  %s1560_s30 = smov (!%p1419_p4, %s1558_s30), 5 }
  0x21   : > { %v380_v10 = vld [vmem:[%s350_s27 + $0x6] sm:$0x3]  ;;  %s378_s8 = scalar_select %p377_p5, 1, 0 }
  0x22   : > { %v391_v9 = vsel %vm388_vm1, %v389_v6, %v390_v7  ;;  %v382_v11 = vmul.f32 %v381_v8, %v380_v10  ;;  %s364_s17 = sadd.s32 %s1411_s12, %s1560_s30  ;;  %s326_s14 = sand.u32 1, %s1249_s19  }
  0x23   : > { %v406_v12 = vrot.slane %v391_v9, 1  ;;  %v580_v13 = vrot.slane %v391_v9, 2  ;;  %s379_s21 = scvt.s32.f32 %s378_s8  ;;  %s1022_s9 = sshll.u32 %s364_s17, 3  ;;  %v672_v24 = vrot.slane %v391_v9, 3  ;;  %v763_v34 = vrot.slane %v391_v9, 4 }
  0x24   : > { %v397_v14 = vsel %vm388_vm1, %v382_v11, %v389_v6  ;;  %s366_s10 = scalar_lea.vmem %s1533_s2, %s1022_s9  ;;  %s1007_s27 = sshll.u32 %s326_s14, 4 }
  0x25   : > { %v405_v15 = vrot.slane %v397_v14, 1  ;;  %v579_v16 = vrot.slane %v397_v14, 2  ;;  %v384_v17 = vstv %s379_s21  ;;  %v383_v20 = vld [vmem:[%s366_s10] sm:$0x3]  ;;  %v671_v23 = vrot.slane %v397_v14, 3  ;;  %s875_s8 = sadd.s32 %s1105_s26, %s1386_s16  ;;  %s328_s9 = scalar_lea.vmem [#allocation2], %s1007_s27 }
  0x26   : > { %v385_v21 = vmul.f32 %v384_v17, %v383_v20  ;;  %v762_v33 = vrot.slane %v397_v14, 4  ;;  %s878_s13 = sshll.u32 %s328_s9, 4  ;;  %s1045_s15 = sshll.u32 %s875_s8, 7  ;;  %s1472_s13 = int_to_ptr.vmem [resolvable:$true] %s878_s13 }
  0x27   : > { %v407_v18 = vsel %vm404_vm2, %v405_v15, %v406_v12  ;;  %v581_v19 = vsel %vm578_vm3, %v579_v16, %v580_v13  ;;  %v673_v30 = vsel %vm670_vm5, %v671_v23, %v672_v24  ;;  %s1477_s22 = scalar_lea.hbm %s1536_s5, %s1045_s15  ;;  %s1479_s16 = scalar_lea.sflag [#allocation3], %s326_s14 }
  0x28   : > { %1073 = vmatprep.mubr.msk.f32.mxu1 %vm410_vm4, %v407_v18  ;;  %1083 = vmatprep.mubr.msk.f32.mxu0 %vm410_vm4, %v581_v19  ;;  %v395_v22 = vrot.slane %v385_v21, 6  ;;  %v764_v36 = vsel %vm415_vm0, %v762_v33, %v763_v34  ;;  %s1179_s30 = scalar_lea.vmem %s1472_s13, 256  ;;  %s1275_s26 = smov [#allocation2]  }
  0x29   : > { %p1180_p6 = scmp.ne.s32.totalorder %s1472_s13, %s1179_s30  ;;  %s1183_s27 = sshll.u32 %s1275_s26, 4  ;;  %s1184_s27 = int_to_ptr.vmem [resolvable:$false] %s1183_s27 }
  0x2a   : > { %v398_v25 = vsel %vm388_vm1, %v390_v7, %v395_v22  ;;  %s1185_s8 = scalar_lea.vmem %s1184_s27, 512  ;;  %p1186_p10 = scmp.lt.s32.totalorder %s1472_s13, %s1184_s27 }
  0x2b   : > { %v408_v26 = vrot.slane %v398_v25, 1  ;;  %v582_v27 = vrot.slane %v398_v25, 2  ;;  %v674_v32 = vrot.slane %v398_v25, 3  ;;  %v765_v37 = vrot.slane %v398_v25, 4  ;;  %p1181_p7 = pnand %p1180_p6, %p1359_p3  ;;  %p1187_p11 = scmp.lt.s32.totalorder %s1185_s8, %s1179_s30 }
  0x2d   : > { %v409_v28 = vsel %vm404_vm2, %v406_v12, %v408_v26  ;;  %v583_v29 = vsel %vm578_vm3, %v580_v13, %v582_v27  ;;  %v675_v35 = vsel %vm670_vm5, %v672_v24, %v674_v32  ;;  %v766_v38 = vsel %vm415_vm0, %v763_v34, %v765_v37  ;;  %p1182_p9 = pneg %p1181_p7  ;;  %p1188_p12 = por %p1187_p11, %p1186_p10 }
  0x2e   : > { %1074 = vmatmul.mubr.msk.f32.vlgmr.msra.gmra.mrb[0].mxu1 %vm410_vm4, %v409_v28  ;;  %1084 = vmatmul.mubr.msk.f32.vlgmr.msra.gmra.mrb[0].mxu0 %vm410_vm4, %v583_v29 }
  0x2f   : > { %1087 = vmatpush3.msk.msra.mxu0 %vm415_vm0, %v1398_v2  ;;  %1077 = vmatpush3.msk.msra.mxu1 %vm415_vm0, %v1403_v3  ;;  %p1189_p13 = pnand %p1188_p12, %p1182_p9 }
  0x30   : > { %1078 = vmatprep.mubr.msk.f32.mxu1 %vm410_vm4, %v397_v14  ;;  %1088 = vmatprep.mubr.msk.f32.mxu0 %vm410_vm4, %v673_v30 }
  0x31   : > { %1091 = vmatprep.subr.msk.mxu0 %vm415_vm0, %v1038_v31 }
  0x36   : > { %1079 = vmatmul.mubr.msk.f32.vlgmr.msra.gmra.mrb[0].mxu1 %vm410_vm4, %v391_v9  ;;  %1089 = vmatmul.mubr.msk.f32.vlgmr.msra.gmra.mrb[0].mxu0 %vm410_vm4, %v675_v35 }
  0x37   : > { %1092 = vmatpush3.msk.msra.mxu0 %vm415_vm0, %v1038_v31  ;;  %1093 = vmatprep.mubr.msk.f32.mxu0 %vm410_vm4, %v764_v36 }
  0x3e   : > { %1094 = vmatmul.mubr.msk.f32.vlgmr.msra.gmra.mrb[0].mxu0 %vm410_vm4, %v766_v38 }
 0x109   : > { %v1080_v39 = vpop.f32.mrb[0].mxu1 }
 0x10a   : > { %v567_v40 = vpop.f32.mrb[1].mxu1 }
 0x111   : > { %v1095_v41 = vpop.f32.mrb[0].mxu0 }
 0x112   : > { %v1096_v43 = vadd.f32 %v1095_v41, %v1080_v39  ;;  %v840_v44 = vpop.f32.mrb[1].mxu0 }
 0x113   : > { %v1097_v45 = vadd.f32 %v840_v44, %v567_v40 }
 0x114   : > { %v859_v46 = vadd.f32 %v1096_v43, %v1042_v42 }
 0x115   : > { %v858_v47 = vadd.f32 %v1097_v45, %v1042_v42 }
 0x116   : > { %861 = vst [vmem:[%s328_s9 + $0x8] sm:$0xff] %v859_v46 }
 0x117   : > { %860 = vst [vmem:[%s328_s9] sm:$0xff] %v858_v47 }
 0x118   : > { %1192 = shalt.err (!%p1189_p13)
}
 0x119   : > { %s1193_s14 = scalar_lea.hbm %s1477_s22, 256  ;;  %s1197_s9 = scalar_lea.hbm %s1536_s5, 1536 }
 0x11a   : > { %p1194_p0 = scmp.ne.s32.totalorder %s1477_s22, %s1193_s14  ;;  %p1198_p4 = scmp.lt.u32.totalorder %s1477_s22, %s1536_s5 }
 0x11b   : > { %p1199_p5 = scmp.lt.u32.totalorder %s1197_s9, %s1193_s14  ;;  %p1201_p7 = scmp.lt.u32.totalorder %s1193_s14, %s1477_s22 }
 0x11c   : > { %p1195_p1 = pnand %p1194_p0, %p1359_p3 }
 0x11d   : > { %p1200_p6 = por %p1199_p5, %p1198_p4 }
 0x11e   : > { %p1196_p2 = pneg %p1195_p1 }
 0x11f   : > { %p1202_p9 = por %p1201_p7, %p1200_p6 }
 0x121   : > { %p1203_p10 = pnand %p1202_p9, %p1196_p2 }
 0x123   : > { %1206 = shalt.err (!%p1203_p10)
}
 0x124   : > { %s1276_s12 = smov 128   ;;  %s1277_s30 = smov 8  }
 0x125   : > { %1106 = dma.vmem_to_hbm [thread:$0]  (%p1359_p3), %s1472_s13, 256, %s1477_s22, %s1479_s16, %s1276_s12, %s1276_s12, %s1277_s30  }
 0x126 PF: > { %p1112_p11 = scmp.ge.s32.totalorder %s1273_s25, 2  ;;  %s893_s26 = sand.u32 1, %s1245_s18  }
 0x127   : > { %s894_s27 = scalar_lea.sflag [#allocation3], %s893_s26 }
 0x128   : > { %p1109_p12 = pnand %p1112_p11, %p1368_p8 }
 0x12a   : > { %1240 = dma.done.wait (!%p1109_p12), %s894_s27, 256  }
 0x12b   : > { %1242 = vsyncadd (!%p1109_p12), %s894_s27, 4294967040  ;;  %s18_s25 = sadd.s32 1, %s1273_s25   ;;  %s1540_s18 = smov %s1249_s19 }
 0x12c   : > { %p15_p13 = scmp.ge.s32.totalorder %s18_s25, 8   ;;  %s1541_s19 = smov %s1253_s20 }
 0x12d   : > { %s1542_s20 = smov %s1377_s11  ;;  %s1543_s21 = smov %s1265_s23 }
 0x12e   : > { %s1544_s22 = smov %s1269_s24  ;;  %s1545_s23 = smov %s1548_s28 }
 0x12f   : > { %s1546_s24 = smov %s1552_s29  ;;  %17 = sbr.rel (!%p15_p13) target bundleno = 5 (0x5), region = 85 }
 0x136   :  { %899 = vsyncpa [#allocation3], 1 }
 0x137   :  { %901 = vsyncpa [#allocation3 + $0x1], 1 }

</bundles_post_ra>
